<compile_context>
chip_gen: v6e
topology: v6e:2x2x1
jax: 0.10.0
libtpu: 0.0.40
codegen_flags: <defaults>
</compile_context>

<pallas_src>
import math

import jax
import jax.numpy as jnp
from jax.experimental import pallas as pl
from jax.experimental.pallas import tpu as pltpu


# ---------------------------------------------------------------------------
# Pallas kernel: out = clip(x + delta * mask, 0, 255), mask broadcast over C
# ---------------------------------------------------------------------------
def _compose_kernel(x_ref, pert_ref, mask_ref, out_ref):
    x = x_ref[...].astype(jnp.float32)          # (1, C,  s, 128)
    delta = pert_ref[...].astype(jnp.float32)   # (1, C,  s, 128)  (bf16 -> f32)
    m = mask_ref[...].astype(jnp.float32)       # (1, Cm, s, 128), Cm in {1, C}
    composed = x + delta * m                    # Additive + Mask (VMEM broadcast over C)
    out_ref[...] = jnp.clip(composed, 0.0, 255.0).astype(out_ref.dtype)


def _vmem_limit_bytes():
    """Generation-aware scoped-VMEM limit (cap well under physical per-TC VMEM)."""
    try:
        kind = jax.devices()[0].device_kind.lower()
    except Exception:
        kind = ""
    if "v7" in kind:
        return 48 * 1024 * 1024   # v7x: 64 MiB physical per TC
    return 96 * 1024 * 1024       # v5e / v6e: 128 MiB physical


def _choose_s_tile(S, C, Cm, x_item, p_item, m_item, budget_bytes, N):
    """Sublane-tile (multiple of 32) sized from the true double-buffered footprint."""
    # Bytes per unit of s across all streams: x + out (x_item each), pert, mask.
    per_s_row = 128 * (2 * C * x_item + C * p_item + Cm * m_item)
    s = budget_bytes // (2 * max(1, per_s_row))        # x2 for double buffering
    s = max(8, (s // 32) * 32)                         # 32 | s covers f32/bf16/u8 tiling
    if N == 1 and S >= 64:
        # Guarantee >=2 parallel grid steps so both v7x TensorCores are used.
        half = -(-S // 2)
        half = -(-half // 32) * 32
        s = max(32, min(s, half))
    return int(min(s, S))


def _compose_pallas(x4, pert4, mask4):
    """x4/pert4: (N, C, S, 128); mask4: (N, Cm, S, 128) with Cm in {1, C}."""
    N, C, S, L = x4.shape
    assert L == 128
    Cm = mask4.shape[1]

    vmem_limit = _vmem_limit_bytes()
    budget = int(0.6 * vmem_limit)                      # headroom for internal scratch
    s_tile = _choose_s_tile(
        S, C, Cm,
        x4.dtype.itemsize, pert4.dtype.itemsize, mask4.dtype.itemsize,
        budget, N,
    )
    grid = (N, pl.cdiv(S, s_tile))                      # ragged tail -> partial blocks

    img_spec = pl.BlockSpec((1, C, s_tile, 128), lambda n, s: (n, 0, s, 0))
    mask_spec = pl.BlockSpec((1, Cm, s_tile, 128), lambda n, s: (n, 0, s, 0))

    elems = N * C * S * 128
    bytes_accessed = (
        x4.size * x4.dtype.itemsize
        + pert4.size * pert4.dtype.itemsize
        + mask4.size * mask4.dtype.itemsize
        + elems * x4.dtype.itemsize                     # output
    )

    return pl.pallas_call(
        _compose_kernel,
        out_shape=jax.ShapeDtypeStruct(x4.shape, x4.dtype),
        grid=grid,
        in_specs=[img_spec, img_spec, mask_spec],
        out_specs=img_spec,
        compiler_params=pltpu.CompilerParams(
            dimension_semantics=("parallel", "parallel"),
            vmem_limit_bytes=vmem_limit,
        ),
        cost_estimate=pl.CostEstimate(
            flops=4 * elems,                # mul + add + 2x clamp per element
            transcendentals=0,
            bytes_accessed=int(bytes_accessed),
        ),
    )(x4, pert4, mask4)


# ---------------------------------------------------------------------------
# Composer wrapper (glue in plain JAX)
# ---------------------------------------------------------------------------
class Composer:
    """JAX/Pallas re-implementation of MART's modular Composer.

    perturber: returns a fixed (deterministically initialized) perturbation
               of the same shape as the input (stored in bf16 to halve HBM reads).
    sequence:  masked-additive then clamp [0, 255], fused in one Pallas kernel.
    """

    def __init__(self, input_shape, eps=8.0, seed=0,
                 return_final_output_only=True, pert_dtype=jnp.bfloat16):
        self.return_final_output_only = return_final_output_only
        key = jax.random.PRNGKey(seed)
        if isinstance(input_shape[0], (tuple, list)):
            keys = jax.random.split(key, len(input_shape))
            self.perturbation = tuple(
                jax.random.uniform(k, tuple(s), jnp.float32, -eps, eps).astype(pert_dtype)
                for k, s in zip(keys, input_shape)
            )
        else:
            self.perturbation = jax.random.uniform(
                key, tuple(input_shape), jnp.float32, -eps, eps
            ).astype(pert_dtype)

    def _perturber(self, input, target):
        del target
        if isinstance(input, (tuple, list)):
            assert isinstance(self.perturbation, tuple)
            assert len(self.perturbation) == len(input)
            for p_i, x_i in zip(self.perturbation, input):
                assert p_i.shape == x_i.shape
            return self.perturbation
        assert self.perturbation.shape == input.shape
        return self.perturbation

    def _compose(self, perturbation, *, input, target):
        mask = target["perturbable_mask"]
        orig_shape = input.shape
        N, C = input.shape[0], input.shape[1]
        Cm = mask.shape[1]
        HW = math.prod(input.shape[2:])

        # Pure reshapes (views) — no HBM-materialized broadcast of the mask.
        x3 = input.reshape(N, C, HW)
        p3 = perturbation.reshape(N, C, HW)
        m3 = mask.reshape(N, Cm, HW)
        if m3.dtype == jnp.bool_:
            m3 = m3.astype(jnp.uint8)           # keep the mask stream 1 byte/elem

        # Pad the flat spatial axis to a multiple of 128 so the lane axis is dense.
        S = -(-HW // 128)
        S_pad = S * 128
        if S_pad != HW:
            # TODO(synk): one extra HBM copy for ragged HW; still far cheaper than
            # a single full-extent block that risks VMEM overflow.
            pad = S_pad - HW
            x3 = jnp.pad(x3, ((0, 0), (0, 0), (0, pad)))
            p3 = jnp.pad(p3, ((0, 0), (0, 0), (0, pad)))
            m3 = jnp.pad(m3, ((0, 0), (0, 0), (0, pad)))

        x4 = x3.reshape(N, C, S, 128)
        p4 = p3.reshape(N, C, S, 128)
        m4 = m3.reshape(N, Cm, S, 128)

        out = _compose_pallas(x4, p4, m4)
        out = out.reshape(N, C, S_pad)[:, :, :HW].reshape(orig_shape)

        if self.return_final_output_only:
            return out
        return {"perturbation": perturbation, "output": out}

    def __call__(self, *, input, target, **kwargs):
        # Branch on the input type BEFORE touching the perturbation so tuple
        # inputs never hit the single-tensor shape assert.
        if isinstance(input, (tuple, list)):
            perturbations = self._perturber(input, target)
            return tuple(
                self._compose(p_i, input=x_i, target=t_i)
                for p_i, x_i, t_i in zip(perturbations, input, target)
            )
        elif isinstance(input, jnp.ndarray):
            perturbation = self._perturber(input, target)
            return self._compose(perturbation, input=input, target=target)
        else:
            raise NotImplementedError


# ---------------------------------------------------------------------------
# Pure-JAX reference for correctness checking
# ---------------------------------------------------------------------------
def _reference(input, perturbation, mask):
    mask = jnp.broadcast_to(mask.astype(jnp.float32), input.shape)
    return jnp.clip(input + perturbation * mask, 0.0, 255.0)


if __name__ == "__main__":
    key = jax.random.PRNGKey(0)
    k_img, k_mask = jax.random.split(key)

    N, C, H, W = 2, 4, 16, 16  # NCHW image batch, values in [0, 255]
    x = jax.random.uniform(k_img, (N, C, H, W), jnp.float32, 0.0, 255.0)
    # Perturbable mask (N,1,H,W), binary, streamed as uint8 (4x fewer bytes).
    mask = (jax.random.uniform(k_mask, (N, 1, H, W)) > 0.3).astype(jnp.uint8)
    target = {"perturbable_mask": mask}

    composer = Composer(input_shape=(N, C, H, W), eps=8.0, seed=0)

    out = composer(input=x, target=target)
    out = jax.block_until_ready(out)

    ref = _reference(x, composer.perturbation.astype(jnp.float32),
                     mask.astype(jnp.float32))
    assert out.shape == x.shape and out.dtype == x.dtype
    assert jnp.allclose(out, ref, atol=1e-5, rtol=1e-5)

    print("KERNEL_OK")
</pallas_src>

<mosaic_0001>
module attributes {stable_mosaic.version = 11 : i64} {
  func.func @_compose_kernel(%arg0: i32, %arg1: i32, %arg2: memref<1x4x2x128xf32, #tpu.memory_space<vmem>>, %arg3: memref<1x4x2x128xbf16, #tpu.memory_space<vmem>>, %arg4: memref<1x1x2x128xi8, #tpu.memory_space<vmem>>, %arg5: memref<1x4x2x128xf32, #tpu.memory_space<vmem>>) attributes {dimension_semantics = [#tpu.dimension_semantics<parallel>, #tpu.dimension_semantics<parallel>], iteration_bounds = array<i64: 2, 1>, scalar_prefetch = 0 : i64, scratch_operands = 0 : i64, tpu.core_type = #tpu.core_type<tc>, window_params = [{transform_indices = @transform_0, window_bounds = array<i64: 1, 4, 2, 128>}, {transform_indices = @transform_1, window_bounds = array<i64: 1, 4, 2, 128>}, {transform_indices = @transform_2, window_bounds = array<i64: 1, 1, 2, 128>}, {transform_indices = @transform_3, window_bounds = array<i64: 1, 4, 2, 128>}]} {
    %c0 = arith.constant 0 : index
    %c0_0 = arith.constant 0 : index
    %c0_1 = arith.constant 0 : index
    %c0_2 = arith.constant 0 : index
    %0 = vector.load %arg2[%c0, %c0_0, %c0_1, %c0_2] : memref<1x4x2x128xf32, #tpu.memory_space<vmem>>, vector<1x4x2x128xf32>
    %c0_3 = arith.constant 0 : index
    %c0_4 = arith.constant 0 : index
    %c0_5 = arith.constant 0 : index
    %c0_6 = arith.constant 0 : index
    %1 = vector.load %arg3[%c0_3, %c0_4, %c0_5, %c0_6] : memref<1x4x2x128xbf16, #tpu.memory_space<vmem>>, vector<1x4x2x128xbf16>
    %2 = arith.extf %1 : vector<1x4x2x128xbf16> to vector<1x4x2x128xf32>
    %c0_7 = arith.constant 0 : index
    %c0_8 = arith.constant 0 : index
    %c0_9 = arith.constant 0 : index
    %c0_10 = arith.constant 0 : index
    %3 = vector.load %arg4[%c0_7, %c0_8, %c0_9, %c0_10] : memref<1x1x2x128xi8, #tpu.memory_space<vmem>>, vector<1x1x2x128xi8>
    %4 = arith.uitofp %3 : vector<1x1x2x128xi8> to vector<1x1x2x128xf32>
    %5 = vector.broadcast %4 : vector<1x1x2x128xf32> to vector<1x4x2x128xf32>
    %6 = arith.mulf %2, %5 : vector<1x4x2x128xf32>
    %7 = arith.addf %0, %6 : vector<1x4x2x128xf32>
    %cst = arith.constant 0.000000e+00 : f32
    %cst_11 = arith.constant 2.550000e+02 : f32
    %8 = vector.broadcast %cst : f32 to vector<1x4x2x128xf32>
    %9 = arith.maximumf %8, %7 : vector<1x4x2x128xf32>
    %10 = vector.broadcast %cst_11 : f32 to vector<1x4x2x128xf32>
    %11 = arith.minimumf %10, %9 : vector<1x4x2x128xf32>
    %c0_12 = arith.constant 0 : index
    %c0_13 = arith.constant 0 : index
    %c0_14 = arith.constant 0 : index
    %c0_15 = arith.constant 0 : index
    %12 = vector.load %arg5[%c0_12, %c0_13, %c0_14, %c0_15] : memref<1x4x2x128xf32, #tpu.memory_space<vmem>>, vector<1x4x2x128xf32>
    tpu.vector_store %arg5[%c0_12, %c0_13, %c0_14, %c0_15], %11 {strides = array<i32>} : memref<1x4x2x128xf32, #tpu.memory_space<vmem>>, vector<1x4x2x128xf32>,
    return
  }
  func.func @transform_0(%arg0: i32, %arg1: i32) -> (i32, i32, i32, i32) {
    %c0_i32 = arith.constant 0 : i32
    %c0_i32_0 = arith.constant 0 : i32
    %c0_i32_1 = arith.constant 0 : i32
    return %arg0, %c0_i32, %arg1, %c0_i32_0 : i32, i32, i32, i32
  }
  func.func @transform_1(%arg0: i32, %arg1: i32) -> (i32, i32, i32, i32) {
    %c0_i32 = arith.constant 0 : i32
    %c0_i32_0 = arith.constant 0 : i32
    %c0_i32_1 = arith.constant 0 : i32
    return %arg0, %c0_i32, %arg1, %c0_i32_0 : i32, i32, i32, i32
  }
  func.func @transform_2(%arg0: i32, %arg1: i32) -> (i32, i32, i32, i32) {
    %c0_i32 = arith.constant 0 : i32
    %c0_i32_0 = arith.constant 0 : i32
    %c0_i32_1 = arith.constant 0 : i32
    return %arg0, %c0_i32, %arg1, %c0_i32_0 : i32, i32, i32, i32
  }
  func.func @transform_3(%arg0: i32, %arg1: i32) -> (i32, i32, i32, i32) {
    %c0_i32 = arith.constant 0 : i32
    %c0_i32_0 = arith.constant 0 : i32
    %c0_i32_1 = arith.constant 0 : i32
    return %arg0, %c0_i32, %arg1, %c0_i32_0 : i32, i32, i32, i32
  }
}

</mosaic_0001>

<bundles_post_ra>
// kernel: tpu_custom_call.1
= control target key start
LH: loop header
LB: loop body
LE: loop exit
PB: predicated region body
PF: predicated region fallthrough
CT: control target
= control target key end

     0   :  { %s898_s0 = inlined_call_operand.hbm [shape: f32[2,4,2,128], index: 0, kind: input, shape index: {}]   ;;  %s899_s1 = inlined_call_operand.hbm [shape: bf16[2,4,2,128], index: 1, kind: input, shape index: {}]   ;;  %s900_s2 = inlined_call_operand.vmem [shape: u8[2,1,2,128], index: 2, kind: input, shape index: {}]   ;;  %s901_s3 = inlined_call_operand.hbm [shape: f32[2,4,2,128], index: 3, kind: output, shape index: {}]  }
   0x1   :  { %902 = sst [smem:[#allocation11_spill]] %s898_s0 }
   0x2   :  { %8 = vsyncpa [#allocation3], 0 }
   0x3   :  { %10 = vsyncpa [#allocation3 + $0x1], 0 }
   0x4   :  { %11 = vsyncpa [#allocation6], 0 }
   0x5   :  { %13 = vsyncpa [#allocation6 + $0x1], 0 }
   0x6   :  { %14 = vsyncpa [#allocation4], 0 }
   0x7   :  { %16 = vsyncpa [#allocation4 + $0x1], 0  ;;  %s713_s12 = smov 0   ;;  %s715_s13 = smov 0  }
   0x8   :  { %s717_s14 = smov 0   ;;  %s719_s15 = smov 0  }
   0x9   :  { %s721_s16 = smov 0   ;;  %s723_s17 = smov 0  }
   0xa LB: > { %s447_s18 = sadd.s32 4294967295, %s682_s17   ;;  %s448_s19 = sadd.s32 4294967294, %s682_s17   ;;  %s682_s17 = sphi %s723_s17, %s22_s17   ;;  %s678_s16 = sphi %s721_s16, %s914_s16   ;;  %s674_s15 = sphi %s719_s15, %s913_s15   ;;  %s670_s14 = sphi %s717_s14, %s912_s14   ;;  %s666_s13 = sphi %s715_s13, %s911_s13   ;;  %s662_s12 = sphi %s713_s12, %s910_s12  }
   0xb   : > { %s34_s20 = sadd.s32 1, %s678_s16  ;;  %s43_s21 = sadd.s32 1, %s670_s14 }
   0xc   : > { %p36_p0 = scmp.ge.s32.totalorder %s34_s20, 2  ;;  %p50_p1 = scmp.ne.s32.totalorder %s670_s14, %s666_s13 }
   0xd   : > { %p51_p2 = scmp.eq.s32.totalorder %s682_s17, 0  ;;  %p56_p3 = scmp.ne.s32.totalorder %s666_s13, %s662_s12 }
   0xe   : > { %s916_s20 = smov (%p36_p0, %s34_s20), 0  ;;  %p57_p5 = scmp.eq.s32.totalorder %s447_s18, 0 }
   0xf   : > { %p754_p4 = por %p51_p2, %p50_p1  ;;  %s38_s23 = ssub.s32 %s678_s16, %s916_s20 }
  0x10   : > { %p138_p6 = scmp.eq.s32.totalorder %s447_s18, 1  ;;  %p41_p7 = scmp.eq.s32.totalorder %s38_s23, 0 }
  0x11   : > { %p760_p8 = por %p57_p5, %p56_p3  ;;  %p144_p10 = scmp.eq.s32.totalorder %s448_s19, 1 }
  0x12   : > { %p764_p9 = por %p138_p6, %p50_p1  ;;  %p450_p12 = scmp.ge.s32.totalorder %s682_s17, 2 }
  0x13   : > { %s769_s26 = scalar_select %p41_p7, %s670_s14, %s43_s21  }
  0x14   : > { %p771_p11 = por %p144_p10, %p56_p3  ;;  %p486_p13 = scmp.lt.s32.totalorder %s682_s17, 2 }
  0x15   : > { %s778_s28 = sand.u32 1, %s670_s14   ;;  %s466_s30 = sshll.u32 %s678_s16, 7 }
  0x16   : > { %s451_s29 = sshll.u32 %s778_s28, 3  ;;  %s907_s0 = sld [smem:[#allocation11_spill]] }
  0x17   : > { %s168_s7 = scalar_lea.vmem [#allocation2], %s451_s29  ;;  %p787_p0 = pnand %p486_p13, %p754_p4 }
  0x18   : > { %s176_s8 = sshll.u32 %s168_s7, 4  ;;  %p457_p1 = scmp.ge.s32.totalorder %s682_s17, 1  ;;  %s177_s8 = int_to_ptr.vmem [resolvable:$true] %s176_s8 }
  0x19   : > { %s165_s10 = scalar_lea.sflag [#allocation3], %s778_s28  ;;  %p544_p2 = pneg %p787_p0 }
  0x1a   : > { %s555_s11 = scalar_lea.vmem %s177_s8, 128  ;;  %s684_s18 = smov [#allocation2]  }
  0x1b   : > { %p556_p3 = scmp.ne.s32.totalorder %s177_s8, %s555_s11  ;;  %s560_s19 = sshll.u32 %s684_s18, 4  ;;  %s561_s19 = int_to_ptr.vmem [resolvable:$false] %s560_s19 }
  0x1c   : > { %s175_s6 = scalar_lea.hbm %s907_s0, %s466_s30  ;;  %s562_s21 = scalar_lea.vmem %s561_s19, 256 }
  0x1d   : > { %p558_p5 = pnand %p556_p3, %p544_p2  ;;  %p563_p4 = scmp.lt.s32.totalorder %s177_s8, %s561_s19 }
  0x1e   : > { %p564_p7 = scmp.lt.s32.totalorder %s562_s21, %s555_s11 }
  0x1f   : > { %p559_p6 = pneg %p558_p5 }
  0x20   : > { %p565_p10 = por %p564_p7, %p563_p4 }
  0x22   : > { %p566_p13 = pnand %p565_p10, %p559_p6 }
  0x24   : > { %569 = shalt.err (!%p566_p13)
}
  0x25   : > { %s685_s22 = smov 32   ;;  %s686_s23 = smov 2  }
  0x26   : > { %478 = dma.hbm_to_vmem [thread:$0]  (!%p787_p0), %s175_s6, 128, %s177_s8, %s165_s10, %s685_s22, %s685_s22, %s686_s23  }
  0x27   : > { %p215_p3 = scmp.lt.s32.totalorder %s682_s17, 3  ;;  %s454_s29 = sshll.u32 %s778_s28, 2 }
  0x28   : > { %s467_s30 = sshll.u32 %s678_s16, 6  ;;  %s190_s18 = scalar_lea.vmem [#allocation5], %s454_s29 }
  0x29   : > { %p805_p5 = pnand %p457_p1, %p215_p3  ;;  %s197_s11 = scalar_lea.hbm %s899_s1, %s467_s30 }
  0x2a   : > { %s198_s19 = sshll.u32 %s190_s18, 4  ;;  %s187_s21 = scalar_lea.sflag [#allocation6], %s778_s28  ;;  %s199_s19 = int_to_ptr.vmem [resolvable:$true] %s198_s19 }
  0x2b   : > { %s583_s0 = scalar_lea.vmem %s199_s19, 64  ;;  %s687_s6 = smov [#allocation5]  }
  0x2c   : > { %p584_p6 = scmp.ne.s32.totalorder %s199_s19, %s583_s0  ;;  %s588_s8 = sshll.u32 %s687_s6, 4  ;;  %s589_s8 = int_to_ptr.vmem [resolvable:$false] %s588_s8 }
  0x2d   : > { %s590_s10 = scalar_lea.vmem %s589_s8, 128  ;;  %p591_p1 = scmp.lt.s32.totalorder %s199_s19, %s589_s8 }
  0x2e   : > { %p586_p4 = pnand %p584_p6, %p544_p2  ;;  %p592_p10 = scmp.lt.s32.totalorder %s590_s10, %s583_s0 }
  0x30   : > { %p587_p7 = pneg %p586_p4  ;;  %p593_p13 = por %p592_p10, %p591_p1 }
  0x32   : > { %p594_p3 = pnand %p593_p13, %p587_p7 }
  0x34   : > { %597 = shalt.err (!%p594_p3)
}
  0x35   : > { %s688_s22 = smov 16   ;;  %s689_s23 = smov 1  }
  0x36   : > { %481 = dma.hbm_to_vmem [thread:$0]  (!%p787_p0), %s197_s11, 64, %s199_s19, %s187_s21, %s688_s22, %s688_s22, %s689_s23  }
  0x37   : > { %219 = sbr.rel (%p805_p5) target bundleno = 99 (0x63), region = 32  ;;  %s821_s28 = sand.u32 (!%p805_p5), 1, %s666_s13  }
  0x38   : > { %s458_s29 = sshll.u32 (!%p805_p5), %s821_s28, 3  ;;  %s222_s0 = scalar_lea.sflag (!%p805_p5), [#allocation3], %s821_s28 }
  0x39   : > { %s225_s30 = scalar_lea.vmem (!%p805_p5), [#allocation2], %s458_s29 }
  0x3c   : > { %649 = dma.done.wait (%p760_p8), %s222_s0, 128  }
  0x3d   : > { %651 = vsyncadd (%p760_p8), %s222_s0, 4294967168  ;;  %s459_s9 = sshll.u32 %s821_s28, 2  ;;  %s231_s4 = scalar_lea.sflag [#allocation6], %s821_s28 }
  0x3e   : > { %s234_s5 = scalar_lea.vmem [#allocation5], %s459_s9 }
  0x3f   : > { %653 = dma.done.wait (%p760_p8), %s231_s4, 64  }
  0x40   : > { %655 = vsyncadd (%p760_p8), %s231_s4, 4294967232  ;;  %p268_p0 = scmp.lt.s32.totalorder %s674_s15, 1  ;;  %v278_v0 = vld [vmem:[%s234_s5] sm:$0x1]  ;;  %v279_v3 = vld [vmem:[%s234_s5 + $0x1] sm:$0x1] }
  0x41   : > { %v282_v4 = vunpack.c.l.bf16 %v278_v0  ;;  %v280_v5 = vld [vmem:[%s234_s5 + $0x2] sm:$0x1]  ;;  %v281_v6 = vld [vmem:[%s234_s5 + $0x3] sm:$0x1]  ;;  %v283_v8 = vunpack.c.l.bf16 %v279_v3  ;;  %v274_v11 = vld [vmem:[%s225_s30] sm:$0x3] }
  0x42   : > { %s269_s7 = scalar_select %p268_p0, %s674_s15, 1  ;;  %v284_v9 = vunpack.c.l.bf16 %v280_v5  ;;  %v285_v10 = vunpack.c.l.bf16 %v281_v6  ;;  %v275_v13 = vld [vmem:[%s225_s30 + $0x2] sm:$0x3]  ;;  %v276_v14 = vld [vmem:[%s225_s30 + $0x4] sm:$0x3] }
  0x43   : > { %v277_v15 = vld [vmem:[%s225_s30 + $0x6] sm:$0x3]  ;;  %s267_s24 = scalar_lea.vmem [#allocation7], %s458_s29  ;;  %s468_s6 = sshll.u32 %s674_s15, 7 }
  0x44   : > { %s273_s19 = scalar_lea.vmem %s900_s2, %s269_s7  ;;  %s325_s21 = sshll.u32 %s267_s24, 4  ;;  %s845_s21 = int_to_ptr.vmem [resolvable:$true] %s325_s21 }
  0x45   : > { %v286_v1 = vld [vmem:[%s273_s19] sm:$0x1]  ;;  %s850_s22 = scalar_lea.hbm %s901_s3, %s468_s6  ;;  %s311_s15 = scalar_lea.sflag [#allocation4], %s821_s28 }
  0x46   : > { %v287_v2 = vunpack.c.0.s8 %v286_v1  ;;  %s598_s23 = scalar_lea.vmem %s845_s21, 128  ;;  %s690_s29 = smov [#allocation7]  }
  0x47   : > { %p599_p8 = scmp.ne.s32.totalorder %s845_s21, %s598_s23  ;;  %s602_s0 = sshll.u32 %s690_s29, 4  ;;  %s603_s0 = int_to_ptr.vmem [resolvable:$false] %s602_s0 }
  0x48   : > { %v288_v7 = vand.u32 255, %v287_v2  ;;  %s604_s30 = scalar_lea.vmem %s603_s0, 256  ;;  %p605_p6 = scmp.lt.s32.totalorder %s845_s21, %s603_s0 }
  0x49   : > { %p600_p2 = pnand %p599_p8, %p764_p9  ;;  %p606_p4 = scmp.lt.s32.totalorder %s604_s30, %s598_s23 }
  0x4a   : > { %v289_v12 = vcvt.s32.f32 %v288_v7 }
  0x4b   : > { %p601_p5 = pneg %p600_p2  ;;  %p607_p7 = por %p606_p4, %p605_p6 }
  0x4c   : > { %v290_v16 = vmul.f32 %v289_v12, %v282_v4  ;;  %v291_v17 = vmul.f32 %v289_v12, %v283_v8  ;;  %v292_v18 = vmul.f32 %v289_v12, %v284_v9  ;;  %v293_v19 = vmul.f32 %v289_v12, %v285_v10 }
  0x4d   : > { %p608_p1 = pnand %p607_p7, %p601_p5 }
  0x4e   : > { %v294_v20 = vadd.f32 %v290_v16, %v274_v11  ;;  %v295_v21 = vadd.f32 %v291_v17, %v275_v13  ;;  %v296_v22 = vadd.f32 %v292_v18, %v276_v14  ;;  %v297_v23 = vadd.f32 %v293_v19, %v277_v15 }
  0x50   : > { %v298_v24 = vmax.f32 %v294_v20, 0.0  ;;  %v299_v25 = vmax.f32 %v295_v21, 0.0  ;;  %v300_v26 = vmax.f32 %v296_v22, 0.0  ;;  %v301_v27 = vmax.f32 %v297_v23, 0.0 }
  0x52   : > { %v302_v28 = vmin.f32 %v298_v24, 255.0  ;;  %v303_v29 = vmin.f32 %v299_v25, 255.0  ;;  %v304_v30 = vmin.f32 %v300_v26, 255.0  ;;  %v305_v31 = vmin.f32 %v301_v27, 255.0 }
  0x54   : > { %306 = vst [vmem:[%s267_s24] sm:$0x3] %v302_v28  ;;  %307 = vst [vmem:[%s267_s24 + $0x2] sm:$0x3] %v303_v29 }
  0x55   : > { %308 = vst [vmem:[%s267_s24 + $0x4] sm:$0x3] %v304_v30  ;;  %309 = vst [vmem:[%s267_s24 + $0x6] sm:$0x3] %v305_v31 }
  0x56   : > { %611 = shalt.err (!%p608_p1)
}
  0x57   : > { %s612_s9 = scalar_lea.hbm %s850_s22, 128  ;;  %s616_s7 = scalar_lea.hbm %s901_s3, 256 }
  0x58   : > { %p613_p10 = scmp.ne.s32.totalorder %s850_s22, %s612_s9  ;;  %p617_p0 = scmp.lt.s32.totalorder %s850_s22, %s901_s3 }
  0x59   : > { %p618_p8 = scmp.lt.s32.totalorder %s616_s7, %s612_s9 }
  0x5a   : > { %p614_p13 = pnand %p613_p10, %p764_p9 }
  0x5b   : > { %p619_p2 = por %p618_p8, %p617_p0 }
  0x5c   : > { %p615_p3 = pneg %p614_p13 }
  0x5e   : > { %p620_p5 = pnand %p619_p2, %p615_p3 }
  0x60   : > { %623 = shalt.err (!%p620_p5)
}
  0x61   : > { %s691_s19 = smov 32   ;;  %s692_s24 = smov 2  }
  0x62   : > { %473 = dma.vmem_to_hbm [thread:$0]  (%p764_p9), %s845_s21, 128, %s850_s22, %s311_s15, %s691_s19, %s691_s19, %s692_s24  }
  0x63 PF: > { %s340_s6 = sand.u32 1, %s662_s12   ;;  %p483_p6 = pnand %p450_p12, %p771_p11 }
  0x64   : > { %s341_s8 = scalar_lea.sflag [#allocation4], %s340_s6 }
  0x65   : > { %p484_p4 = pneg %p483_p6 }
  0x67   : > { %657 = dma.done.wait (%p484_p4), %s341_s8, 128  }
  0x68   : > { %659 = vsyncadd (%p484_p4), %s341_s8, 4294967168  ;;  %s22_s17 = sadd.s32 1, %s682_s17   ;;  %s910_s12 = smov %s666_s13 }
  0x69   : > { %p19_p7 = scmp.ge.s32.totalorder %s22_s17, 4   ;;  %s911_s13 = smov %s670_s14 }
  0x6a   : > { %s912_s14 = smov %s769_s26  ;;  %s913_s15 = smov %s678_s16 }
  0x6b   : > { %s914_s16 = smov %s916_s20  ;;  %21 = sbr.rel (!%p19_p7) target bundleno = 10 (0xa), region = 93 }
  0x70   :  { %346 = vsyncpa [#allocation3], 1 }
  0x71   :  { %348 = vsyncpa [#allocation3 + $0x1], 1 }
  0x72   :  { %349 = vsyncpa [#allocation6], 1 }
  0x73   :  { %351 = vsyncpa [#allocation6 + $0x1], 1 }
  0x74   :  { %352 = vsyncpa [#allocation4], 1 }
  0x75   :  { %354 = vsyncpa [#allocation4 + $0x1], 1 }

</bundles_post_ra>
